<compile_context>
chip_gen: v7x
topology: tpu7x:2x2x1
jax: 0.10.0
libtpu: 0.0.40
codegen_flags: <defaults>
</compile_context>

<pallas_src>
import functools

import jax
import jax.numpy as jnp
from jax.experimental import pallas as pl
from jax.experimental.pallas import tpu as pltpu

LN_EPS = 1e-5  # torch.nn.LayerNorm default


# ---------------------------------------------------------------------------
# Kernel 1: fused Linear + LayerNorm (Q / K / V projections)
#   grid = (row_tiles, k_tiles); f32 accumulator in VMEM; LN applied at finalize.
# ---------------------------------------------------------------------------
def _linear_layernorm_kernel(x_ref, w_ref, b_ref, g_ref, beta_ref, o_ref, acc_ref):
    k = pl.program_id(1)

    @pl.when(k == 0)
    def _():
        acc_ref[...] = jnp.zeros_like(acc_ref)

    acc_ref[...] += jnp.dot(x_ref[...], w_ref[...],
                            preferred_element_type=jnp.float32)

    @pl.when(k == pl.num_programs(1) - 1)
    def _():
        y = acc_ref[...] + b_ref[...]
        # one-pass moments: halves the cross-lane (XLU) reductions vs two-pass
        mean = jnp.mean(y, axis=-1, keepdims=True)
        msq = jnp.mean(y * y, axis=-1, keepdims=True)
        var = msq - mean * mean
        yn = (y - mean) * jax.lax.rsqrt(var + LN_EPS)
        o_ref[...] = (yn * g_ref[...] + beta_ref[...]).astype(o_ref.dtype)


def _pick_row_tile(n, target=256):
    # full array if small; otherwise a fixed tile (partial last block is masked on store)
    return n if n <= target else target


def _pick_k_tile(din, target=512):
    # the K-reduction tile must evenly divide Din (padded K blocks would corrupt the
    # accumulator), so fall back to the full reduction if no nice divisor exists.
    if din <= target:
        return din
    for t in (target, 256, 128):
        if din % t == 0:
            return t
    return din


def linear_layernorm(x, w, b, gamma, beta):
    N, Din = x.shape
    Dout = w.shape[1]
    tm = _pick_row_tile(N)
    tk = _pick_k_tile(Din)
    grid = (pl.cdiv(N, tm), pl.cdiv(Din, tk))
    return pl.pallas_call(
        _linear_layernorm_kernel,
        out_shape=jax.ShapeDtypeStruct((N, Dout), x.dtype),
        grid=grid,
        in_specs=[
            pl.BlockSpec((tm, tk), lambda i, k: (i, k)),
            pl.BlockSpec((tk, Dout), lambda i, k: (k, 0)),
            pl.BlockSpec((1, Dout), lambda i, k: (0, 0)),
            pl.BlockSpec((1, Dout), lambda i, k: (0, 0)),
            pl.BlockSpec((1, Dout), lambda i, k: (0, 0)),
        ],
        out_specs=pl.BlockSpec((tm, Dout), lambda i, k: (i, 0)),
        scratch_shapes=[pltpu.VMEM((tm, Dout), jnp.float32)],
        compiler_params=pltpu.CompilerParams(
            dimension_semantics=("parallel", "arbitrary")),
    )(x, w, b.reshape(1, Dout), gamma.reshape(1, Dout), beta.reshape(1, Dout))


# ---------------------------------------------------------------------------
# Kernel 2: multi-head softmax attention on (B, S, feature) layout.
#   Heads are sliced out of the lane axis in-kernel (no XLA transposes), head
#   outputs are concatenated in VMEM, and the output Linear is fused as a single
#   dense MXU matmul.  grid = (batch, q_row_tiles).
# ---------------------------------------------------------------------------
def _mha_body(q_ref, k_ref, v_ref, wo_ref, bo_ref, o_ref, w_ref, n_heads):
    key_dim = q_ref.shape[-1]
    value_dim = v_ref.shape[-1]
    dh = key_dim // n_heads
    dvh = value_dim // n_heads

    # fold the 1/sqrt(dh) scale into Q (tq*key_dim muls instead of H*tq*Sk)
    q = q_ref[...].astype(jnp.float32) * (1.0 / float(dh) ** 0.5)
    k = k_ref[...].astype(jnp.float32)
    v = v_ref[...]

    head_outs = []
    for h in range(n_heads):                     # static unroll, n_heads is small
        qh = q[:, h * dh:(h + 1) * dh]           # static lane slice
        kh = k[:, h * dh:(h + 1) * dh]
        vh = v[:, h * dvh:(h + 1) * dvh]

        # (tq, Sk) = qh @ kh^T on the MXU
        s = jax.lax.dot_general(qh, kh, (((1,), (1,)), ((), ())),
                                preferred_element_type=jnp.float32)
        m = jnp.max(s, axis=-1, keepdims=True)
        p = jnp.exp(s - m)
        denom = jnp.sum(p, axis=-1, keepdims=True)
        attn = p * pl.reciprocal(denom, approx=True)     # EUP approx reciprocal

        if w_ref is not None:
            w_ref[h, :, :] = attn.astype(w_ref.dtype)

        head_outs.append(jnp.dot(attn.astype(v.dtype), vh,
                                 preferred_element_type=jnp.float32))

    merged = jnp.concatenate(head_outs, axis=-1)         # (tq, value_dim)
    out = jnp.dot(merged, wo_ref[...].astype(jnp.float32),
                  preferred_element_type=jnp.float32) + bo_ref[...]
    o_ref[...] = out.astype(o_ref.dtype)


def _mha_kernel(q_ref, k_ref, v_ref, wo_ref, bo_ref, o_ref, *, n_heads):
    _mha_body(q_ref, k_ref, v_ref, wo_ref, bo_ref, o_ref, None, n_heads)


def _mha_kernel_with_weights(q_ref, k_ref, v_ref, wo_ref, bo_ref, o_ref, w_ref,
                             *, n_heads):
    _mha_body(q_ref, k_ref, v_ref, wo_ref, bo_ref, o_ref, w_ref, n_heads)


def _pick_q_tile(sq, target=256):
    return sq if sq <= 512 else target


def multi_head_attention_core(q, k, v, wo, bo, n_heads, return_attention_weights):
    """q: (B,Sq,key_dim); k: (B,Sk,key_dim); v: (B,Sk,value_dim); wo: (value_dim,value_dim)."""
    B, Sq, key_dim = q.shape
    Sk = k.shape[1]
    value_dim = v.shape[2]
    tq = _pick_q_tile(Sq)
    grid = (B, pl.cdiv(Sq, tq))

    in_specs = [
        pl.BlockSpec((None, tq, key_dim), lambda b, qi: (b, qi, 0)),
        pl.BlockSpec((None, Sk, key_dim), lambda b, qi: (b, 0, 0)),
        pl.BlockSpec((None, Sk, value_dim), lambda b, qi: (b, 0, 0)),
        pl.BlockSpec((value_dim, value_dim), lambda b, qi: (0, 0)),
        pl.BlockSpec((1, value_dim), lambda b, qi: (0, 0)),
    ]
    o_shape = jax.ShapeDtypeStruct((B, Sq, value_dim), q.dtype)
    o_spec = pl.BlockSpec((None, tq, value_dim), lambda b, qi: (b, qi, 0))
    cparams = pltpu.CompilerParams(dimension_semantics=("parallel", "parallel"))
    args = (q, k, v, wo, bo.reshape(1, value_dim))

    if return_attention_weights:
        w_shape = jax.ShapeDtypeStruct((B, n_heads, Sq, Sk), jnp.float32)
        w_spec = pl.BlockSpec((None, n_heads, tq, Sk), lambda b, qi: (b, 0, qi, 0))
        out, weights = pl.pallas_call(
            functools.partial(_mha_kernel_with_weights, n_heads=n_heads),
            out_shape=(o_shape, w_shape),
            grid=grid,
            in_specs=in_specs,
            out_specs=(o_spec, w_spec),
            compiler_params=cparams,
        )(*args)
        return out, weights

    out = pl.pallas_call(
        functools.partial(_mha_kernel, n_heads=n_heads),
        out_shape=o_shape,
        grid=grid,
        in_specs=in_specs,
        out_specs=o_spec,
        compiler_params=cparams,
    )(*args)
    return out, None


# ---------------------------------------------------------------------------
# Full module forward (glue in plain JAX, hot paths in Pallas)
# ---------------------------------------------------------------------------
def multi_head_attention_forward(params, query, key, value, n_heads,
                                 return_attention_weights=False):
    B, Sq, _ = query.shape
    Sk = key.shape[1]

    q = linear_layernorm(query.reshape(B * Sq, -1),
                         params["wq"], params["bq"], params["gq"], params["betaq"])
    k = linear_layernorm(key.reshape(B * Sk, -1),
                         params["wk"], params["bk"], params["gk"], params["betak"])
    v = linear_layernorm(value.reshape(B * Sk, -1),
                         params["wv"], params["bv"], params["gv"], params["betav"])

    key_dim = q.shape[-1]
    value_dim = v.shape[-1]

    # free reshapes only -- no head-split transposes in XLA
    q3 = q.reshape(B, Sq, key_dim)
    k3 = k.reshape(B, Sk, key_dim)
    v3 = v.reshape(B, Sk, value_dim)

    out, attn_weights = multi_head_attention_core(
        q3, k3, v3, params["wo"], params["bo"], n_heads, return_attention_weights)

    if return_attention_weights:
        return out, attn_weights
    return out


def init_params(query_input_dim, key_input_dim, value_input_dim,
                key_dim, value_dim, seed=0):
    key = jax.random.PRNGKey(seed)
    ks = jax.random.split(key, 8)
    f32 = jnp.float32
    return {
        # Linear weights stored as (in, out)  (== PyTorch weight.T)
        "wq": jax.random.normal(ks[0], (query_input_dim, key_dim), f32) * 0.1,
        "bq": jax.random.normal(ks[1], (key_dim,), f32) * 0.01,
        "gq": jnp.ones((key_dim,), f32),
        "betaq": jnp.zeros((key_dim,), f32),
        "wk": jax.random.normal(ks[2], (key_input_dim, key_dim), f32) * 0.1,
        "bk": jax.random.normal(ks[3], (key_dim,), f32) * 0.01,
        "gk": jnp.ones((key_dim,), f32),
        "betak": jnp.zeros((key_dim,), f32),
        "wv": jax.random.normal(ks[4], (value_input_dim, value_dim), f32) * 0.1,
        "bv": jax.random.normal(ks[5], (value_dim,), f32) * 0.01,
        "gv": jnp.ones((value_dim,), f32),
        "betav": jnp.zeros((value_dim,), f32),
        "wo": jax.random.normal(ks[6], (value_dim, value_dim), f32) * 0.1,
        "bo": jax.random.normal(ks[7], (value_dim,), f32) * 0.01,
    }


# ---------------------------------------------------------------------------
# Pure-JAX reference (numerical sanity check)
# ---------------------------------------------------------------------------
def _reference_forward(params, query, key, value, n_heads):
    def lin_ln(x, w, b, g, beta):
        y = x @ w + b
        mean = y.mean(-1, keepdims=True)
        var = ((y - mean) ** 2).mean(-1, keepdims=True)
        return (y - mean) / jnp.sqrt(var + LN_EPS) * g + beta

    q = lin_ln(query, params["wq"], params["bq"], params["gq"], params["betaq"])
    k = lin_ln(key, params["wk"], params["bk"], params["gk"], params["betak"])
    v = lin_ln(value, params["wv"], params["bv"], params["gv"], params["betav"])
    B, Sq, _ = query.shape
    Sk = key.shape[1]
    dh = q.shape[-1] // n_heads
    dvh = v.shape[-1] // n_heads
    qh = q.reshape(B, Sq, n_heads, dh).transpose(0, 2, 1, 3)
    kh = k.reshape(B, Sk, n_heads, dh).transpose(0, 2, 1, 3)
    vh = v.reshape(B, Sk, n_heads, dvh).transpose(0, 2, 1, 3)
    s = jnp.einsum("bhqd,bhkd->bhqk", qh, kh) / jnp.sqrt(jnp.float32(dh))
    w_ = jax.nn.softmax(s, axis=-1)
    o = jnp.einsum("bhqk,bhkd->bhqd", w_, vh).transpose(0, 2, 1, 3).reshape(B, Sq, -1)
    return o @ params["wo"] + params["bo"], w_


if __name__ == "__main__":
    B, Sq, Sk = 2, 8, 8
    query_input_dim = key_input_dim = value_input_dim = 32
    key_dim = value_dim = 32
    n_heads = 4

    params = init_params(query_input_dim, key_input_dim, value_input_dim,
                         key_dim, value_dim, seed=0)

    dk = jax.random.split(jax.random.PRNGKey(0), 3)
    query = jax.random.normal(dk[0], (B, Sq, query_input_dim), jnp.float32)
    key_ant = jax.random.normal(dk[1], (B, Sk, key_input_dim), jnp.float32)
    value_ant = jax.random.normal(dk[2], (B, Sk, value_input_dim), jnp.float32)

    # fast path: no attention-weights HBM write
    out = multi_head_attention_forward(params, query, key_ant, value_ant, n_heads)
    out = jax.block_until_ready(out)
    assert out.shape == (B, Sq, value_dim)

    # weights path (separate kernel variant)
    out_w, weights = multi_head_attention_forward(
        params, query, key_ant, value_ant, n_heads, return_attention_weights=True)
    jax.block_until_ready((out_w, weights))
    assert out_w.shape == (B, Sq, value_dim)
    assert weights.shape == (B, n_heads, Sq, Sk)

    ref_out, ref_w = _reference_forward(params, query, key_ant, value_ant, n_heads)
    assert jnp.allclose(out, ref_out, atol=1e-2, rtol=1e-2)
    assert jnp.allclose(out_w, ref_out, atol=1e-2, rtol=1e-2)
    assert jnp.allclose(weights, ref_w, atol=1e-2, rtol=1e-2)

    print("KERNEL_OK")
</pallas_src>

<mosaic_0001>
module attributes {stable_mosaic.version = 11 : i64} {
  func.func @_linear_layernorm_kernel(%arg0: i32, %arg1: i32, %arg2: memref<16x32xf32, #tpu.memory_space<vmem>>, %arg3: memref<32x32xf32, #tpu.memory_space<vmem>>, %arg4: memref<1x32xf32, #tpu.memory_space<vmem>>, %arg5: memref<1x32xf32, #tpu.memory_space<vmem>>, %arg6: memref<1x32xf32, #tpu.memory_space<vmem>>, %arg7: memref<16x32xf32, #tpu.memory_space<vmem>>, %arg8: memref<16x32xf32, #tpu.memory_space<vmem>>) attributes {dimension_semantics = [#tpu.dimension_semantics<parallel>, #tpu.dimension_semantics<arbitrary>], iteration_bounds = array<i64: 1, 1>, scalar_prefetch = 0 : i64, scratch_operands = 1 : i64, tpu.core_type = #tpu.core_type<tc>, window_params = [{transform_indices = @transform_0, window_bounds = array<i64: 16, 32>}, {transform_indices = @transform_1, window_bounds = array<i64: 32, 32>}, {pipeline_mode = #tpu.pipeline_mode<synchronous>, transform_indices = @transform_2, window_bounds = array<i64: 1, 32>}, {pipeline_mode = #tpu.pipeline_mode<synchronous>, transform_indices = @transform_3, window_bounds = array<i64: 1, 32>}, {pipeline_mode = #tpu.pipeline_mode<synchronous>, transform_indices = @transform_4, window_bounds = array<i64: 1, 32>}, {transform_indices = @transform_5, window_bounds = array<i64: 16, 32>}]} {
    %c0_i32 = arith.constant 0 : i32
    %0 = arith.cmpi eq, %arg1, %c0_i32 : i32
    %1 = arith.extui %0 : i1 to i32
    %c0_i32_0 = arith.constant 0 : i32
    %2 = arith.cmpi ne, %1, %c0_i32_0 : i32
    scf.if %2 {
      %cst_10 = arith.constant 0.000000e+00 : f32
      %12 = vector.broadcast %cst_10 : f32 to vector<16x32xf32>
      %c0_11 = arith.constant 0 : index
      %c0_12 = arith.constant 0 : index
      %13 = vector.load %arg8[%c0_11, %c0_12] : memref<16x32xf32, #tpu.memory_space<vmem>>, vector<16x32xf32>
      tpu.vector_store %arg8[%c0_11, %c0_12], %12 {strides = array<i32>} : memref<16x32xf32, #tpu.memory_space<vmem>>, vector<16x32xf32>,
    } else {
    }
    %c0 = arith.constant 0 : index
    %c0_1 = arith.constant 0 : index
    %3 = vector.load %arg8[%c0, %c0_1] : memref<16x32xf32, #tpu.memory_space<vmem>>, vector<16x32xf32>
    %c0_2 = arith.constant 0 : index
    %c0_3 = arith.constant 0 : index
    %4 = vector.load %arg2[%c0_2, %c0_3] : memref<16x32xf32, #tpu.memory_space<vmem>>, vector<16x32xf32>
    %c0_4 = arith.constant 0 : index
    %c0_5 = arith.constant 0 : index
    %5 = vector.load %arg3[%c0_4, %c0_5] : memref<32x32xf32, #tpu.memory_space<vmem>>, vector<32x32xf32>
    %cst = arith.constant dense<0.000000e+00> : vector<16x32xf32>
    %6 = tpu.matmul %4, %5, %cst {dimension_numbers = #tpu.dot_dimension_numbers<[1], [0], [0], [1], [0, 0, 1, 1], [], []>} : vector<16x32xf32>, vector<32x32xf32>, vector<16x32xf32> -> vector<16x32xf32>
    %7 = arith.addf %3, %6 : vector<16x32xf32>
    %c0_6 = arith.constant 0 : index
    %c0_7 = arith.constant 0 : index
    %8 = vector.load %arg8[%c0_6, %c0_7] : memref<16x32xf32, #tpu.memory_space<vmem>>, vector<16x32xf32>
    tpu.vector_store %arg8[%c0_6, %c0_7], %7 {strides = array<i32>} : memref<16x32xf32, #tpu.memory_space<vmem>>, vector<16x32xf32>,
    %c0_i32_8 = arith.constant 0 : i32
    %9 = arith.cmpi eq, %arg1, %c0_i32_8 : i32
    %10 = arith.extui %9 : i1 to i32
    %c0_i32_9 = arith.constant 0 : i32
    %11 = arith.cmpi ne, %10, %c0_i32_9 : i32
    scf.if %11 {
      %c0_10 = arith.constant 0 : index
      %c0_11 = arith.constant 0 : index
      %12 = vector.load %arg8[%c0_10, %c0_11] : memref<16x32xf32, #tpu.memory_space<vmem>>, vector<16x32xf32>
      %c0_12 = arith.constant 0 : index
      %c0_13 = arith.constant 0 : index
      %13 = vector.load %arg4[%c0_12, %c0_13] : memref<1x32xf32, #tpu.memory_space<vmem>>, vector<1x32xf32>
      %14 = vector.broadcast %13 : vector<1x32xf32> to vector<16x32xf32>
      %15 = arith.addf %12, %14 : vector<16x32xf32>
      %cst_14 = arith.constant dense<0.000000e+00> : vector<16xf32>
      %16 = vector.multi_reduction <add>, %15, %cst_14 [1] : vector<16x32xf32> to vector<16xf32>
      %17 = vector.shape_cast %16 : vector<16xf32> to vector<16x1xf32>
      %cst_15 = arith.constant 3.200000e+01 : f32
      %18 = vector.broadcast %cst_15 : f32 to vector<16x1xf32>
      %19 = arith.divf %17, %18 : vector<16x1xf32>
      %20 = arith.mulf %15, %15 : vector<16x32xf32>
      %cst_16 = arith.constant dense<0.000000e+00> : vector<16xf32>
      %21 = vector.multi_reduction <add>, %20, %cst_16 [1] : vector<16x32xf32> to vector<16xf32>
      %22 = vector.shape_cast %21 : vector<16xf32> to vector<16x1xf32>
      %cst_17 = arith.constant 3.200000e+01 : f32
      %23 = vector.broadcast %cst_17 : f32 to vector<16x1xf32>
      %24 = arith.divf %22, %23 : vector<16x1xf32>
      %25 = arith.mulf %19, %19 : vector<16x1xf32>
      %26 = arith.subf %24, %25 : vector<16x1xf32>
      %27 = vector.broadcast %19 : vector<16x1xf32> to vector<16x32xf32>
      %28 = arith.subf %15, %27 : vector<16x32xf32>
      %cst_18 = arith.constant 9.99999974E-6 : f32
      %29 = vector.broadcast %cst_18 : f32 to vector<16x1xf32>
      %30 = arith.addf %26, %29 : vector<16x1xf32>
      %31 = math.rsqrt %30 : vector<16x1xf32>
      %32 = vector.broadcast %31 : vector<16x1xf32> to vector<16x32xf32>
      %33 = arith.mulf %28, %32 : vector<16x32xf32>
      %c0_19 = arith.constant 0 : index
      %c0_20 = arith.constant 0 : index
      %34 = vector.load %arg5[%c0_19, %c0_20] : memref<1x32xf32, #tpu.memory_space<vmem>>, vector<1x32xf32>
      %35 = vector.broadcast %34 : vector<1x32xf32> to vector<16x32xf32>
      %36 = arith.mulf %33, %35 : vector<16x32xf32>
      %c0_21 = arith.constant 0 : index
      %c0_22 = arith.constant 0 : index
      %37 = vector.load %arg6[%c0_21, %c0_22] : memref<1x32xf32, #tpu.memory_space<vmem>>, vector<1x32xf32>
      %38 = vector.broadcast %37 : vector<1x32xf32> to vector<16x32xf32>
      %39 = arith.addf %36, %38 : vector<16x32xf32>
      %c0_23 = arith.constant 0 : index
      %c0_24 = arith.constant 0 : index
      %40 = vector.load %arg7[%c0_23, %c0_24] : memref<16x32xf32, #tpu.memory_space<vmem>>, vector<16x32xf32>
      tpu.vector_store %arg7[%c0_23, %c0_24], %39 {strides = array<i32>} : memref<16x32xf32, #tpu.memory_space<vmem>>, vector<16x32xf32>,
    } else {
    }
    return
  }
  func.func @transform_0(%arg0: i32, %arg1: i32) -> (i32, i32) {
    %c0_i32 = arith.constant 0 : i32
    return %arg0, %arg1 : i32, i32
  }
  func.func @transform_1(%arg0: i32, %arg1: i32) -> (i32, i32) {
    %c0_i32 = arith.constant 0 : i32
    %c0_i32_0 = arith.constant 0 : i32
    return %arg1, %c0_i32 : i32, i32
  }
  func.func @transform_2(%arg0: i32, %arg1: i32) -> (i32, i32) {
    %c0_i32 = arith.constant 0 : i32
    %c0_i32_0 = arith.constant 0 : i32
    %c0_i32_1 = arith.constant 0 : i32
    return %c0_i32, %c0_i32_0 : i32, i32
  }
  func.func @transform_3(%arg0: i32, %arg1: i32) -> (i32, i32) {
    %c0_i32 = arith.constant 0 : i32
    %c0_i32_0 = arith.constant 0 : i32
    %c0_i32_1 = arith.constant 0 : i32
    return %c0_i32, %c0_i32_0 : i32, i32
  }
  func.func @transform_4(%arg0: i32, %arg1: i32) -> (i32, i32) {
    %c0_i32 = arith.constant 0 : i32
    %c0_i32_0 = arith.constant 0 : i32
    %c0_i32_1 = arith.constant 0 : i32
    return %c0_i32, %c0_i32_0 : i32, i32
  }
  func.func @transform_5(%arg0: i32, %arg1: i32) -> (i32, i32) {
    %c0_i32 = arith.constant 0 : i32
    %c0_i32_0 = arith.constant 0 : i32
    return %arg0, %c0_i32 : i32, i32
  }
}

</mosaic_0001>

<bundles_post_ra>
// kernel: tpu_custom_call.1
= control target key start
LH: loop header
LB: loop body
LE: loop exit
PB: predicated region body
PF: predicated region fallthrough
CT: control target
= control target key end

     0   :  { %10 = vsyncpa [#allocation4], 0  ;;  %s447_s0 = inlined_call_operand.hbm [shape: f32[16,32], index: 0, kind: input, shape index: {}]   ;;  %s448_s1 = inlined_call_operand.hbm [shape: f32[32,32], index: 1, kind: input, shape index: {}]   ;;  %s449_s2 = inlined_call_operand.vmem [shape: f32[1,32], index: 2, kind: input, shape index: {}]   ;;  %s450_s3 = inlined_call_operand.vmem [shape: f32[1,32], index: 3, kind: input, shape index: {}]   ;;  %s451_s4 = inlined_call_operand.vmem [shape: f32[1,32], index: 4, kind: input, shape index: {}]   ;;  %s452_s5 = inlined_call_operand.hbm [shape: f32[16,32], index: 5, kind: output, shape index: {}]  }
   0x1   :  { %11 = vsyncpa [#allocation7], 0 }
   0x2   :  { %12 = vsyncpa [#allocation5], 0  ;;  %s345_s18 = smov [#allocation3]   ;;  %s273_s22 = scalar_lea.hbm %s447_s0, 256 }
   0x3   :  { %s18_s19 = sshll.u32 %s345_s18, 4  ;;  %p274_p0 = scmp.ne.s32.totalorder %s447_s0, %s273_s22  ;;  %s19_s19 = int_to_ptr.vmem [resolvable:$true] %s18_s19 }
   0x4   :  { %p277_p1 = scmp.lt.u32.totalorder %s273_s22, %s447_s0 }
   0x6   :  { %p279_p2 = pnand %p277_p1, %p274_p0 }
   0x8   :  { %282 = shalt.err (!%p279_p2)
}
   0x9   :  { %s283_s27 = scalar_lea.vmem %s19_s19, 256  ;;  %p288_p4 = scmp.lt.s32.totalorder %s19_s19, %s19_s19 }
   0xa   :  { %p284_p3 = scmp.ne.s32.totalorder %s19_s19, %s283_s27  ;;  %p289_p5 = scmp.lt.s32.totalorder %s283_s27, %s283_s27 }
   0xc   :  { %p290_p6 = por %p289_p5, %p288_p4 }
   0xe   :  { %p291_p7 = pnand %p290_p6, %p284_p3 }
  0x10   :  { %294 = shalt.err (!%p291_p7)
}
  0x11   :  { %s346_s28 = smov 128   ;;  %s347_s29 = smov 8  }
  0x12   :  { %24 = dma.hbm_to_vmem [thread:$0]  %s447_s0, 256, %s19_s19, [#allocation4], %s346_s28, %s346_s28, %s347_s29  }
  0x13   :  { %s348_s7 = smov [#allocation6]   ;;  %s295_s11 = scalar_lea.hbm %s448_s1, 512 }
  0x14   :  { %s30_s8 = sshll.u32 %s348_s7, 4  ;;  %p296_p8 = scmp.ne.s32.totalorder %s448_s1, %s295_s11  ;;  %s31_s8 = int_to_ptr.vmem [resolvable:$true] %s30_s8 }
  0x15   :  { %p299_p9 = scmp.lt.u32.totalorder %s295_s11, %s448_s1 }
  0x17   :  { %p301_p10 = pnand %p299_p9, %p296_p8 }
  0x19   :  { %304 = shalt.err (!%p301_p10)
}
  0x1a   :  { %s305_s16 = scalar_lea.vmem %s31_s8, 512  ;;  %p310_p12 = scmp.lt.s32.totalorder %s31_s8, %s31_s8 }
  0x1b   :  { %p306_p11 = scmp.ne.s32.totalorder %s31_s8, %s305_s16  ;;  %p311_p13 = scmp.lt.s32.totalorder %s305_s16, %s305_s16 }
  0x1d   :  { %p312_p0 = por %p311_p13, %p310_p12 }
  0x1f   :  { %p313_p1 = pnand %p312_p0, %p306_p11 }
  0x21   :  { %316 = shalt.err (!%p313_p1)
}
  0x22   :  { %36 = dma.hbm_to_vmem [thread:$0]  %s448_s1, 512, %s31_s8, [#allocation7], %s346_s28, %s346_s28, %s347_s29  }
  0x23   :  { %339 = dma.done.wait [#allocation4], 256  }
  0x24   :  { %340 = vsyncadd [#allocation4], 4294967040 }
  0x25   :  { %341 = dma.done.wait [#allocation7], 512  }
  0x26   :  { %342 = vsyncadd [#allocation7], 4294966784  ;;  %vm53_vm0 = vcmask 261120   ;;  %v349_v0 = vmov 0.0   ;;  %v60_v1 = vld [vmem:[#allocation6] sm:$0xff]  ;;  %v61_v2 = vld [vmem:[#allocation6 + $0x8] sm:$0xff] }
  0x27   :  { %55 = vst.msk [vmem:[#allocation2 + $0x8] sm:$0xff] %vm53_vm0, %v349_v0  ;;  %54 = vst.msk [vmem:[#allocation2] sm:$0xff] %vm53_vm0, %v349_v0  ;;  %v62_v3 = vld [vmem:[#allocation6 + $0x10] sm:$0xff]  ;;  %v255_v4 = vpack.c.bf16 %v61_v2, %v60_v1  ;;  %v63_v5 = vld [vmem:[#allocation6 + $0x18] sm:$0xff]  ;;  %s350_s22 = smov [#allocation8]  }
  0x28   :  { %v58_v6 = vld [vmem:[#allocation3] sm:$0xff]  ;;  %v259_v7 = vpack.c.bf16 %v63_v5, %v62_v3  ;;  %v59_v8 = vld [vmem:[#allocation3 + $0x8] sm:$0xff]  ;;  %v235_v15 = vld [vmem:[%s449_s2] ss:$0 sm:$0xff]  ;;  %s220_s23 = sshll.u32 %s350_s22, 4  ;;  %s221_s23 = int_to_ptr.vmem [resolvable:$true] %s220_s23 }
  0x29   :  { %252 = vmatprep.mubr.msk.f32.mxu0 %vm53_vm0, %v58_v6  ;;  %256 = vmatprep.subr.bf16.mxu0 %v255_v4  ;;  %v236_v42 = vld [vmem:[%s450_s3] ss:$0 sm:$0xff]  ;;  %s317_s3 = scalar_lea.vmem %s221_s23, 256  ;;  %p322_p3 = scmp.lt.s32.totalorder %s221_s23, %s221_s23 }
  0x2a   :  { %258 = vmatpush3.bf16.msra.mxu0 %v255_v4  ;;  %v237_v44 = vld [vmem:[%s451_s4] ss:$0 sm:$0xff]  ;;  %p318_p2 = scmp.ne.s32.totalorder %s221_s23, %s317_s3  ;;  %p323_p4 = scmp.lt.s32.totalorder %s317_s3, %s317_s3 }
  0x2b   :  { %260 = vmatprep.subr.bf16.mxu0 %v259_v7 }
  0x2c   :  { %p324_p5 = por %p323_p4, %p322_p3 }
  0x2e   :  { %262 = vmatpush3.bf16.msra.mxu0 %v259_v7  ;;  %v57_v9 = vld [vmem:[#allocation2 + $0x8] sm:$0xff]  ;;  %v56_v10 = vld [vmem:[#allocation2] sm:$0xff]  ;;  %p325_p6 = pnand %p324_p5, %p318_p2 }
  0x31   :  { %253 = vmatmul.mubr.msk.f32.vlgmr.msra.gmra.mrb[0].mxu0 %vm53_vm0, %v59_v8 }
 0x104   :  { %v254_v11 = vpop.f32.mrb[0].mxu0 }
 0x105   :  { %v147_v12 = vadd.f32 %v254_v11, %v57_v9  ;;  %v137_v13 = vpop.f32.mrb[1].mxu0 }
 0x106   :  { %v146_v14 = vadd.f32 %v137_v13, %v56_v10 }
 0x107   :  { %149 = vst.msk [vmem:[#allocation2 + $0x8] sm:$0xff] %vm53_vm0, %v147_v12 }
 0x108   :  { %148 = vst.msk [vmem:[#allocation2] sm:$0xff] %vm53_vm0, %v146_v14 }
 0x10e   :  { %v154_v16 = vld [vmem:[#allocation2 + $0x8] sm:$0xff] }
 0x10f   :  { %v153_v17 = vld [vmem:[#allocation2] sm:$0xff]  ;;  %v163_v19 = vadd.f32 %v235_v15, %v154_v16 }
 0x110   :  { %v162_v18 = vadd.f32 %v235_v15, %v153_v17 }
 0x111   :  { %v174_v23 = vmul.f32 %v163_v19, %v163_v19  ;;  %v167_v24 = vsel %vm53_vm0, %v163_v19, 0.0 }
 0x112   :  { %v164_v20 = vsel %vm53_vm0, %v162_v18, 0.0  ;;  %v173_v21 = vmul.f32 %v162_v18, %v162_v18 }
 0x113   :  { %165 = vadd.xlane.f32.xlu0 %v164_v20  ;;  %v178_v25 = vsel %vm53_vm0, %v174_v23, 0.0 }
 0x114   :  { %v175_v22 = vsel %vm53_vm0, %v173_v21, 0.0 }
 0x115   :  { %176 = vadd.xlane.f32.xlu1 %v175_v22 }
 0x117   :  { %168 = vadd.xlane.f32.xlu0 %v167_v24 }
 0x119   :  { %179 = vadd.xlane.f32.xlu1 %v178_v25 }
 0x1a0   :  { %v166_v26 = vpop.xlane.xlu0 %165 }
 0x1a1   :  { %v171_v27 = vmul.f32 0.03125, %v166_v26 }
 0x1a2   :  { %v177_v28 = vpop.xlane.xlu1 %176 }
 0x1a3   :  { %v183_v29 = vmul.f32 %v171_v27, %v171_v27  ;;  %v181_v30 = vmul.f32 0.03125, %v177_v28  ;;  %v187_v40 = vsub.f32 %v162_v18, %v171_v27 }
 0x1a4   :  { %v169_v31 = vpop.xlane.xlu0 %168 }
 0x1a5   :  { %v185_v32 = vsub.f32 %v181_v30, %v183_v29  ;;  %v172_v33 = vmul.f32 0.03125, %v169_v31 }
 0x1a6   :  { %v180_v34 = vpop.xlane.xlu1 %179 }
 0x1a7   :  { %v189_v35 = vadd.f32 1e-05, %v185_v32  ;;  %v184_v36 = vmul.f32 %v172_v33, %v172_v33  ;;  %v182_v37 = vmul.f32 0.03125, %v180_v34  ;;  %v188_v45 = vsub.f32 %v163_v19, %v172_v33 }
 0x1a9   :  { %269 = vrsqrt.f32 %v189_v35  ;;  %v186_v38 = vsub.f32 %v182_v37, %v184_v36 }
 0x1ab   :  { %v190_v39 = vadd.f32 1e-05, %v186_v38 }
 0x1ad   :  { %271 = vrsqrt.f32 %v190_v39 }
 0x1b3   :  { %v270_v41 = vpop.eup %269 }
 0x1b4   :  { %v193_v43 = vmul.f32 %v270_v41, %v187_v40 }
 0x1b6   :  { %v202_v46 = vmul.f32 %v236_v42, %v193_v43 }
 0x1b7   :  { %v272_v47 = vpop.eup %271 }
 0x1b8   :  { %v194_v48 = vmul.f32 %v272_v47, %v188_v45  ;;  %v211_v49 = vadd.f32 %v237_v44, %v202_v46 }
 0x1ba   :  { %v203_v50 = vmul.f32 %v236_v42, %v194_v48  ;;  %213 = vst.msk [vmem:[#allocation8] sm:$0xff] %vm53_vm0, %v211_v49 }
 0x1bc   :  { %v212_v51 = vadd.f32 %v237_v44, %v203_v50 }
 0x1be   :  { %214 = vst.msk [vmem:[#allocation8 + $0x8] sm:$0xff] %vm53_vm0, %v212_v51 }
 0x1bf   :  { %328 = shalt.err (!%p325_p6)
}
 0x1c0   :  { %s329_s25 = scalar_lea.hbm %s452_s5, 256 }
 0x1c1   :  { %p330_p7 = scmp.ne.s32.totalorder %s452_s5, %s329_s25  ;;  %p333_p8 = scmp.lt.u32.totalorder %s329_s25, %s452_s5 }
 0x1c3   :  { %p335_p9 = pnand %p333_p8, %p330_p7 }
 0x1c5   :  { %338 = shalt.err (!%p335_p9)
}
 0x1c6   :  { %226 = dma.vmem_to_hbm [thread:$0]  %s221_s23, 256, %s452_s5, [#allocation5], %s346_s28, %s346_s28, %s347_s29  }
 0x1c7   :  { %343 = dma.done.wait [#allocation5], 256  }
 0x1c8   :  { %344 = vsyncadd [#allocation5], 4294967040 }
 0x1c9   :  { %230 = vsyncpa [#allocation4], 1 }
 0x1ca   :  { %231 = vsyncpa [#allocation7], 1 }
 0x1cb   :  { %232 = vsyncpa [#allocation5], 1 }

</bundles_post_ra>
